<compile_context>
chip_gen: v5e
topology: v5e:2x2
jax: 0.10.0
libtpu: 0.0.40
codegen_flags: <defaults>
</compile_context>

<pallas_src>
import functools

import jax
import jax.numpy as jnp
from jax import lax
from jax.experimental import pallas as pl
from jax.experimental.pallas import tpu as pltpu


def _round_up(x, m):
    return ((x + m - 1) // m) * m


def _vmem_capacity_bytes():
    """Best-effort physical VMEM query; conservative (v7x) fallback."""
    try:
        info = pltpu.get_tpu_info()
        cap = getattr(info, "vmem_capacity_bytes", None)
        if cap:
            return int(cap)
    except Exception:
        pass
    return 64 * 1024 * 1024  # v7x per-TensorCore VMEM; safe everywhere


def _make_kernel(C, TP, P, inv_p, tiles_per_split):
    def kernel(x_ref, t_ref, ce_ref, inter_ref, union_ref):
        s_id = pl.program_id(0)   # pixel-axis split (megacore helper, size 1 or 2)
        q = pl.program_id(2)      # pixel-tile index within this split

        @pl.when(q == 0)
        def _init():
            ce_ref[...] = jnp.zeros_like(ce_ref)
            inter_ref[...] = jnp.zeros_like(inter_ref)
            union_ref[...] = jnp.zeros_like(union_ref)

        # Global (logical, pre-clamp) pixel offset of this tile; used to build a
        # validity mask that handles the ragged tail and any phantom split tile.
        start = (s_id * tiles_per_split + q) * TP
        lane = lax.broadcasted_iota(jnp.int32, (1, TP), 1)
        valid = (start + lane) < P                       # (1, TP) bool
        vf = valid.astype(jnp.float32)

        # Select (not multiply) so tail garbage (possibly Inf/NaN) can't leak.
        x = jnp.where(valid, x_ref[...].astype(jnp.float32), 0.0)   # (C, TP)
        t = jnp.where(valid, t_ref[...].astype(jnp.int32), -1)      # (1, TP)

        # --- softmax / logsumexp over the class axis (axis 0) ---
        m = jnp.max(x, axis=0, keepdims=True)            # (1, TP)
        e = jnp.exp(x - m)                                # (C, TP)
        s = jnp.sum(e, axis=0, keepdims=True)             # (1, TP)
        inv_s = pl.reciprocal(s)                           # exact; one (1,TP) EUP op
        softmax = e * inv_s                                # (C, TP)
        lse = m + jnp.log(s)                               # (1, TP)

        # --- one-hot(target) built in-kernel (zero for masked pixels) ---
        class_ids = lax.broadcasted_iota(jnp.int32, (C, TP), 0)
        onehot = (class_ids == t).astype(jnp.float32)      # (C, TP)

        # --- cross-entropy partial sum for this tile (normalized by P) ---
        picked = jnp.sum(x * onehot, axis=0, keepdims=True)          # (1, TP)
        ce_terms = (lse - picked) * vf                                # (1, TP)
        ce_ref[...] += jnp.sum(ce_terms, axis=1, keepdims=True) * inv_p

        # --- dice partial sums: per-class intersection / union over the tile ---
        inter_ref[...] += jnp.sum(softmax * onehot, axis=1, keepdims=True)  # (C,1)
        union_ref[...] += jnp.sum((softmax + onehot) * vf, axis=1,
                                  keepdims=True)                            # (C,1)

    return kernel


@functools.partial(jax.jit, static_argnames=("w_dice", "smooth", "tp_cap"))
def dice_ce_loss(logits, target, w_dice=0.5, smooth=1e-6, tp_cap=None):
    """logits: (N, C, H, W) float (any dtype); target: (N, H, W) int labels."""
    N, C, H, W = logits.shape
    P = H * W

    x_itemsize = jnp.dtype(logits.dtype).itemsize
    t_dtype = jnp.int8 if C <= 127 else jnp.int32
    t_itemsize = jnp.dtype(t_dtype).itemsize

    # ---- tile sizing from a VMEM budget (generation-aware, v7x-safe) ----
    vmem_cap = _vmem_capacity_bytes()
    vmem_limit = int(min(3 * vmem_cap // 4, 96 * 1024 * 1024))
    tile_budget = vmem_limit // 2
    # Conservative per-pixel VMEM bytes of one in-flight tile:
    #   2x double-buffered logits + 2x double-buffered targets
    #   + ~8 live f32 (C,TP) intermediates + ~12 live f32 (1,TP) rows.
    per_pixel = 2 * C * x_itemsize + 2 * t_itemsize + 8 * C * 4 + 12 * 4

    tp_max = max(4096, tile_budget // per_pixel)
    if tp_cap is not None:                       # testing override
        tp_max = min(tp_max, int(tp_cap))
    tp_max = max(128, (int(tp_max) // 128) * 128)

    P128 = _round_up(P, 128)
    tp_max = min(tp_max, P128)
    grid_p = pl.cdiv(P128, tp_max)
    TP = _round_up(pl.cdiv(P128, grid_p), 128)   # balanced tiles, multiple of 128

    # 2-way pixel split so both v7x TensorCores have parallel work when N == 1.
    split = 2 if (N == 1 and grid_p >= 2) else 1
    tiles_per_split = pl.cdiv(grid_p, split)
    last_tile = grid_p - 1

    # ---- inputs: no padding, native dtypes ----
    x = logits.reshape(N, C, P)                       # free reshape, native dtype
    t = target.reshape(N, 1, P).astype(t_dtype)       # int8 (or int32 if C > 127)

    def in_map(s, n, q):
        # Clamp so a phantom tile (odd grid_p with split=2) never DMAs OOB; its
        # contribution is zeroed by the in-kernel validity mask anyway.
        return (n, 0, jnp.minimum(s * tiles_per_split + q, last_tile))

    out_map = lambda s, n, q: (s, n, 0, 0)

    kernel = _make_kernel(C, TP, P, 1.0 / float(P), tiles_per_split)
    ce_out, inter_out, union_out = pl.pallas_call(
        kernel,
        out_shape=(
            jax.ShapeDtypeStruct((split, N, 1, 1), jnp.float32),  # per-split/batch CE
            jax.ShapeDtypeStruct((split, N, C, 1), jnp.float32),  # intersections
            jax.ShapeDtypeStruct((split, N, C, 1), jnp.float32),  # unions
        ),
        grid_spec=pltpu.PrefetchScalarGridSpec(
            num_scalar_prefetch=0,
            grid=(split, N, tiles_per_split),
            in_specs=[
                pl.BlockSpec((None, C, TP), in_map),
                pl.BlockSpec((None, 1, TP), in_map),
            ],
            out_specs=[
                pl.BlockSpec((None, None, 1, 1), out_map),
                pl.BlockSpec((None, None, C, 1), out_map),
                pl.BlockSpec((None, None, C, 1), out_map),
            ],
        ),
        compiler_params=pltpu.CompilerParams(
            dimension_semantics=("parallel", "parallel", "arbitrary"),
            vmem_limit_bytes=vmem_limit,
        ),
    )(x, t)

    # Final reduction / mixing in plain JAX (cheap, keeps kernel outputs parallel).
    ce = jnp.sum(ce_out) / N                              # mean over N*H*W pixels
    inter = jnp.sum(inter_out, axis=0)[:, :, 0]           # (N, C)
    union = jnp.sum(union_out, axis=0)[:, :, 0]           # (N, C)
    dice = 2.0 * inter / (union + smooth)
    dice_loss_v = 1.0 - jnp.mean(dice)
    return (1.0 - w_dice) * ce + w_dice * dice_loss_v


def _reference_loss(logits, target, w_dice=0.5, smooth=1e-6):
    """Pure-JAX reference mirroring the PyTorch forward semantics."""
    N, C, H, W = logits.shape
    logp = jax.nn.log_softmax(logits.astype(jnp.float32), axis=1)
    ce = -jnp.mean(jnp.take_along_axis(logp, target[:, None, :, :], axis=1))

    pred = jax.nn.softmax(logits.astype(jnp.float32), axis=1)
    onehot = jnp.transpose(jax.nn.one_hot(target, C, dtype=jnp.float32),
                           (0, 3, 1, 2))
    inter = jnp.sum(pred * onehot, axis=(2, 3))
    union = jnp.sum(pred, axis=(2, 3)) + jnp.sum(onehot, axis=(2, 3))
    dice = 2.0 * inter / (union + smooth)
    dice_loss = 1.0 - jnp.mean(dice)
    return (1.0 - w_dice) * ce + w_dice * dice_loss


if __name__ == "__main__":
    key = jax.random.PRNGKey(0)
    k1, k2, k3, k4 = jax.random.split(key, 4)

    # Case 1: standard small shape, single big tile, batch axis parallel.
    N, C, H, W = 2, 4, 16, 16
    logits = jax.random.normal(k1, (N, C, H, W), dtype=jnp.float32)
    target = jax.random.randint(k2, (N, H, W), 0, C, dtype=jnp.int32)
    loss = jax.block_until_ready(dice_ce_loss(logits, target))
    ref = _reference_loss(logits, target)
    assert jnp.allclose(loss, ref, rtol=1e-5, atol=1e-5), (loss, ref)

    # Case 2: ragged P (324, not a multiple of 128), multiple tiles (tp_cap=128)
    # and N == 1, exercising the in-kernel tail mask + 2-way pixel split path.
    N2, C2, H2, W2 = 1, 4, 18, 18
    logits2 = jax.random.normal(k3, (N2, C2, H2, W2), dtype=jnp.float32)
    target2 = jax.random.randint(k4, (N2, H2, W2), 0, C2, dtype=jnp.int32)
    loss2 = jax.block_until_ready(dice_ce_loss(logits2, target2, tp_cap=128))
    ref2 = _reference_loss(logits2, target2)
    assert jnp.allclose(loss2, ref2, rtol=1e-5, atol=1e-5), (loss2, ref2)

    print("KERNEL_OK")
</pallas_src>

<mosaic_0001>
module attributes {stable_mosaic.version = 11 : i64} {
  func.func @kernel(%arg0: i32, %arg1: i32, %arg2: i32, %arg3: memref<1x4x256xf32, #tpu.memory_space<vmem>>, %arg4: memref<1x1x256xi8, #tpu.memory_space<vmem>>, %arg5: memref<1x1x1x1xf32, #tpu.memory_space<vmem>>, %arg6: memref<1x1x4x1xf32, #tpu.memory_space<vmem>>, %arg7: memref<1x1x4x1xf32, #tpu.memory_space<vmem>>) attributes {dimension_semantics = [#tpu.dimension_semantics<parallel>, #tpu.dimension_semantics<parallel>, #tpu.dimension_semantics<arbitrary>], iteration_bounds = array<i64: 1, 2, 1>, scalar_prefetch = 0 : i64, scratch_operands = 0 : i64, tpu.core_type = #tpu.core_type<tc>, window_params = [{transform_indices = @transform_0, window_bounds = array<i64: 1, 4, 256>}, {transform_indices = @transform_1, window_bounds = array<i64: 1, 1, 256>}, {transform_indices = @transform_2, window_bounds = array<i64: 1, 1, 1, 1>}, {transform_indices = @transform_3, window_bounds = array<i64: 1, 1, 4, 1>}, {transform_indices = @transform_4, window_bounds = array<i64: 1, 1, 4, 1>}]} {
    %c0_i32 = arith.constant 0 : i32
    %0 = arith.cmpi eq, %arg2, %c0_i32 : i32
    %1 = arith.extui %0 : i1 to i32
    %c0_i32_0 = arith.constant 0 : i32
    %2 = arith.cmpi ne, %1, %c0_i32_0 : i32
    scf.if %2 {
      %cst_38 = arith.constant 0.000000e+00 : f32
      %76 = vector.broadcast %cst_38 : f32 to vector<1x1xf32>
      %c0_39 = arith.constant 0 : index
      %c0_40 = arith.constant 0 : index
      %c0_41 = arith.constant 0 : index
      %c0_42 = arith.constant 0 : index
      %77 = vector.load %arg5[%c0_39, %c0_40, %c0_41, %c0_42] : memref<1x1x1x1xf32, #tpu.memory_space<vmem>>, vector<1x1x1x1xf32>
      %78 = vector.shape_cast %77 : vector<1x1x1x1xf32> to vector<1x1xf32>
      %79 = vector.shape_cast %76 : vector<1x1xf32> to vector<1x1x1x1xf32>
      tpu.vector_store %arg5[%c0_39, %c0_40, %c0_41, %c0_42], %79 {strides = array<i32>} : memref<1x1x1x1xf32, #tpu.memory_space<vmem>>, vector<1x1x1x1xf32>,
      %cst_43 = arith.constant 0.000000e+00 : f32
      %80 = vector.broadcast %cst_43 : f32 to vector<4x1xf32>
      %c0_44 = arith.constant 0 : index
      %c0_45 = arith.constant 0 : index
      %c0_46 = arith.constant 0 : index
      %c0_47 = arith.constant 0 : index
      %81 = vector.load %arg6[%c0_44, %c0_45, %c0_46, %c0_47] : memref<1x1x4x1xf32, #tpu.memory_space<vmem>>, vector<1x1x4x1xf32>
      %82 = vector.shape_cast %81 : vector<1x1x4x1xf32> to vector<4x1xf32>
      %83 = vector.shape_cast %80 : vector<4x1xf32> to vector<1x1x4x1xf32>
      tpu.vector_store %arg6[%c0_44, %c0_45, %c0_46, %c0_47], %83 {strides = array<i32>} : memref<1x1x4x1xf32, #tpu.memory_space<vmem>>, vector<1x1x4x1xf32>,
      %cst_48 = arith.constant 0.000000e+00 : f32
      %84 = vector.broadcast %cst_48 : f32 to vector<4x1xf32>
      %c0_49 = arith.constant 0 : index
      %c0_50 = arith.constant 0 : index
      %c0_51 = arith.constant 0 : index
      %c0_52 = arith.constant 0 : index
      %85 = vector.load %arg7[%c0_49, %c0_50, %c0_51, %c0_52] : memref<1x1x4x1xf32, #tpu.memory_space<vmem>>, vector<1x1x4x1xf32>
      %86 = vector.shape_cast %85 : vector<1x1x4x1xf32> to vector<4x1xf32>
      %87 = vector.shape_cast %84 : vector<4x1xf32> to vector<1x1x4x1xf32>
      tpu.vector_store %arg7[%c0_49, %c0_50, %c0_51, %c0_52], %87 {strides = array<i32>} : memref<1x1x4x1xf32, #tpu.memory_space<vmem>>, vector<1x1x4x1xf32>,
    } else {
    }
    %c1_i32 = arith.constant 1 : i32
    %3 = arith.muli %arg0, %c1_i32 : i32
    %4 = arith.addi %3, %arg2 : i32
    %c256_i32 = arith.constant 256 : i32
    %5 = arith.muli %4, %c256_i32 : i32
    %6 = tpu.iota {dimensions = array<i32: 1>} : vector<1x256xi32>
    %7 = vector.broadcast %5 : i32 to vector<1x256xi32>
    %8 = arith.addi %7, %6 : vector<1x256xi32>
    %c256_i32_1 = arith.constant 256 : i32
    %9 = vector.broadcast %c256_i32_1 : i32 to vector<1x256xi32>
    %10 = arith.cmpi slt, %8, %9 : vector<1x256xi32>
    %11 = arith.extui %10 : vector<1x256xi1> to vector<1x256xi32>
    %12 = arith.sitofp %11 : vector<1x256xi32> to vector<1x256xf32>
    %c0 = arith.constant 0 : index
    %c0_2 = arith.constant 0 : index
    %c0_3 = arith.constant 0 : index
    %13 = vector.load %arg3[%c0, %c0_2, %c0_3] : memref<1x4x256xf32, #tpu.memory_space<vmem>>, vector<1x4x256xf32>
    %14 = vector.shape_cast %13 : vector<1x4x256xf32> to vector<4x256xf32>
    %cst = arith.constant 0.000000e+00 : f32
    %15 = vector.shape_cast %10 : vector<1x256xi1> to vector<1x256xi1>
    %16 = vector.broadcast %15 : vector<1x256xi1> to vector<4x256xi1>
    %17 = vector.broadcast %cst : f32 to vector<4x256xf32>
    %18 = arith.select %16, %14, %17 : vector<4x256xi1>, vector<4x256xf32>
    %c0_4 = arith.constant 0 : index
    %c0_5 = arith.constant 0 : index
    %c0_6 = arith.constant 0 : index
    %19 = vector.load %arg4[%c0_4, %c0_5, %c0_6] : memref<1x1x256xi8, #tpu.memory_space<vmem>>, vector<1x1x256xi8>
    %20 = vector.shape_cast %19 : vector<1x1x256xi8> to vector<1x256xi8>
    %21 = arith.extsi %20 : vector<1x256xi8> to vector<1x256xi32>
    %c-1_i32 = arith.constant -1 : i32
    %22 = vector.broadcast %c-1_i32 : i32 to vector<1x256xi32>
    %23 = arith.select %10, %21, %22 : vector<1x256xi1>, vector<1x256xi32>
    %cst_7 = arith.constant dense<0xFF800000> : vector<256xf32>
    %24 = vector.multi_reduction <maximumf>, %18, %cst_7 [0] : vector<4x256xf32> to vector<256xf32>
    %25 = vector.shape_cast %24 : vector<256xf32> to vector<1x256xf32>
    %26 = vector.broadcast %25 : vector<1x256xf32> to vector<4x256xf32>
    %27 = arith.subf %18, %26 : vector<4x256xf32>
    %28 = math.exp %27 : vector<4x256xf32>
    %cst_8 = arith.constant dense<0.000000e+00> : vector<256xf32>
    %29 = vector.multi_reduction <add>, %28, %cst_8 [0] : vector<4x256xf32> to vector<256xf32>
    %30 = vector.shape_cast %29 : vector<256xf32> to vector<1x256xf32>
    %31 = tpu.reciprocal %30 : vector<1x256xf32> -> vector<1x256xf32>
    %32 = vector.broadcast %31 : vector<1x256xf32> to vector<4x256xf32>
    %33 = arith.mulf %28, %32 : vector<4x256xf32>
    %34 = math.log %30 : vector<1x256xf32>
    %35 = arith.addf %25, %34 : vector<1x256xf32>
    %36 = tpu.iota {dimensions = array<i32: 0>} : vector<4x256xi32>
    %37 = vector.broadcast %23 : vector<1x256xi32> to vector<4x256xi32>
    %38 = arith.cmpi eq, %36, %37 : vector<4x256xi32>
    %39 = arith.extui %38 : vector<4x256xi1> to vector<4x256xi32>
    %40 = arith.sitofp %39 : vector<4x256xi32> to vector<4x256xf32>
    %41 = arith.mulf %18, %40 : vector<4x256xf32>
    %cst_9 = arith.constant dense<0.000000e+00> : vector<256xf32>
    %42 = vector.multi_reduction <add>, %41, %cst_9 [0] : vector<4x256xf32> to vector<256xf32>
    %43 = vector.shape_cast %42 : vector<256xf32> to vector<1x256xf32>
    %44 = arith.subf %35, %43 : vector<1x256xf32>
    %45 = arith.mulf %44, %12 : vector<1x256xf32>
    %c0_10 = arith.constant 0 : index
    %c0_11 = arith.constant 0 : index
    %c0_12 = arith.constant 0 : index
    %c0_13 = arith.constant 0 : index
    %46 = vector.load %arg5[%c0_10, %c0_11, %c0_12, %c0_13] : memref<1x1x1x1xf32, #tpu.memory_space<vmem>>, vector<1x1x1x1xf32>
    %47 = vector.shape_cast %46 : vector<1x1x1x1xf32> to vector<1x1xf32>
    %cst_14 = arith.constant dense<0.000000e+00> : vector<1xf32>
    %48 = vector.multi_reduction <add>, %45, %cst_14 [1] : vector<1x256xf32> to vector<1xf32>
    %49 = vector.shape_cast %48 : vector<1xf32> to vector<1x1xf32>
    %cst_15 = arith.constant 3.906250e-03 : f32
    %50 = vector.broadcast %cst_15 : f32 to vector<1x1xf32>
    %51 = arith.mulf %49, %50 : vector<1x1xf32>
    %52 = arith.addf %47, %51 : vector<1x1xf32>
    %c0_16 = arith.constant 0 : index
    %c0_17 = arith.constant 0 : index
    %c0_18 = arith.constant 0 : index
    %c0_19 = arith.constant 0 : index
    %53 = vector.load %arg5[%c0_16, %c0_17, %c0_18, %c0_19] : memref<1x1x1x1xf32, #tpu.memory_space<vmem>>, vector<1x1x1x1xf32>
    %54 = vector.shape_cast %53 : vector<1x1x1x1xf32> to vector<1x1xf32>
    %55 = vector.shape_cast %52 : vector<1x1xf32> to vector<1x1x1x1xf32>
    tpu.vector_store %arg5[%c0_16, %c0_17, %c0_18, %c0_19], %55 {strides = array<i32>} : memref<1x1x1x1xf32, #tpu.memory_space<vmem>>, vector<1x1x1x1xf32>,
    %c0_20 = arith.constant 0 : index
    %c0_21 = arith.constant 0 : index
    %c0_22 = arith.constant 0 : index
    %c0_23 = arith.constant 0 : index
    %56 = vector.load %arg6[%c0_20, %c0_21, %c0_22, %c0_23] : memref<1x1x4x1xf32, #tpu.memory_space<vmem>>, vector<1x1x4x1xf32>
    %57 = vector.shape_cast %56 : vector<1x1x4x1xf32> to vector<4x1xf32>
    %58 = arith.mulf %33, %40 : vector<4x256xf32>
    %cst_24 = arith.constant dense<0.000000e+00> : vector<4xf32>
    %59 = vector.multi_reduction <add>, %58, %cst_24 [1] : vector<4x256xf32> to vector<4xf32>
    %60 = vector.shape_cast %59 : vector<4xf32> to vector<4x1xf32>
    %61 = arith.addf %57, %60 : vector<4x1xf32>
    %c0_25 = arith.constant 0 : index
    %c0_26 = arith.constant 0 : index
    %c0_27 = arith.constant 0 : index
    %c0_28 = arith.constant 0 : index
    %62 = vector.load %arg6[%c0_25, %c0_26, %c0_27, %c0_28] : memref<1x1x4x1xf32, #tpu.memory_space<vmem>>, vector<1x1x4x1xf32>
    %63 = vector.shape_cast %62 : vector<1x1x4x1xf32> to vector<4x1xf32>
    %64 = vector.shape_cast %61 : vector<4x1xf32> to vector<1x1x4x1xf32>
    tpu.vector_store %arg6[%c0_25, %c0_26, %c0_27, %c0_28], %64 {strides = array<i32>} : memref<1x1x4x1xf32, #tpu.memory_space<vmem>>, vector<1x1x4x1xf32>,
    %c0_29 = arith.constant 0 : index
    %c0_30 = arith.constant 0 : index
    %c0_31 = arith.constant 0 : index
    %c0_32 = arith.constant 0 : index
    %65 = vector.load %arg7[%c0_29, %c0_30, %c0_31, %c0_32] : memref<1x1x4x1xf32, #tpu.memory_space<vmem>>, vector<1x1x4x1xf32>
    %66 = vector.shape_cast %65 : vector<1x1x4x1xf32> to vector<4x1xf32>
    %67 = arith.addf %33, %40 : vector<4x256xf32>
    %68 = vector.broadcast %12 : vector<1x256xf32> to vector<4x256xf32>
    %69 = arith.mulf %67, %68 : vector<4x256xf32>
    %cst_33 = arith.constant dense<0.000000e+00> : vector<4xf32>
    %70 = vector.multi_reduction <add>, %69, %cst_33 [1] : vector<4x256xf32> to vector<4xf32>
    %71 = vector.shape_cast %70 : vector<4xf32> to vector<4x1xf32>
    %72 = arith.addf %66, %71 : vector<4x1xf32>
    %c0_34 = arith.constant 0 : index
    %c0_35 = arith.constant 0 : index
    %c0_36 = arith.constant 0 : index
    %c0_37 = arith.constant 0 : index
    %73 = vector.load %arg7[%c0_34, %c0_35, %c0_36, %c0_37] : memref<1x1x4x1xf32, #tpu.memory_space<vmem>>, vector<1x1x4x1xf32>
    %74 = vector.shape_cast %73 : vector<1x1x4x1xf32> to vector<4x1xf32>
    %75 = vector.shape_cast %72 : vector<4x1xf32> to vector<1x1x4x1xf32>
    tpu.vector_store %arg7[%c0_34, %c0_35, %c0_36, %c0_37], %75 {strides = array<i32>} : memref<1x1x4x1xf32, #tpu.memory_space<vmem>>, vector<1x1x4x1xf32>,
    return
  }
  func.func @transform_0(%arg0: i32, %arg1: i32, %arg2: i32) -> (i32, i32, i32) {
    %c1_i32 = arith.constant 1 : i32
    %0 = arith.muli %arg0, %c1_i32 : i32
    %1 = arith.addi %0, %arg2 : i32
    %c0_i32 = arith.constant 0 : i32
    %2 = arith.minsi %1, %c0_i32 : i32
    %c0_i32_0 = arith.constant 0 : i32
    %c0_i32_1 = arith.constant 0 : i32
    return %arg1, %c0_i32_0, %2 : i32, i32, i32
  }
  func.func @transform_1(%arg0: i32, %arg1: i32, %arg2: i32) -> (i32, i32, i32) {
    %c1_i32 = arith.constant 1 : i32
    %0 = arith.muli %arg0, %c1_i32 : i32
    %1 = arith.addi %0, %arg2 : i32
    %c0_i32 = arith.constant 0 : i32
    %2 = arith.minsi %1, %c0_i32 : i32
    %c0_i32_0 = arith.constant 0 : i32
    %c0_i32_1 = arith.constant 0 : i32
    return %arg1, %c0_i32_0, %2 : i32, i32, i32
  }
  func.func @transform_2(%arg0: i32, %arg1: i32, %arg2: i32) -> (i32, i32, i32, i32) {
    %c0_i32 = arith.constant 0 : i32
    %c0_i32_0 = arith.constant 0 : i32
    %c0_i32_1 = arith.constant 0 : i32
    return %arg0, %arg1, %c0_i32, %c0_i32_0 : i32, i32, i32, i32
  }
  func.func @transform_3(%arg0: i32, %arg1: i32, %arg2: i32) -> (i32, i32, i32, i32) {
    %c0_i32 = arith.constant 0 : i32
    %c0_i32_0 = arith.constant 0 : i32
    %c0_i32_1 = arith.constant 0 : i32
    return %arg0, %arg1, %c0_i32, %c0_i32_0 : i32, i32, i32, i32
  }
  func.func @transform_4(%arg0: i32, %arg1: i32, %arg2: i32) -> (i32, i32, i32, i32) {
    %c0_i32 = arith.constant 0 : i32
    %c0_i32_0 = arith.constant 0 : i32
    %c0_i32_1 = arith.constant 0 : i32
    return %arg0, %arg1, %c0_i32, %c0_i32_0 : i32, i32, i32, i32
  }
}

</mosaic_0001>

<bundles_post_ra>
// kernel: dice_ce_loss.1
= control target key start
LH: loop header
LB: loop body
LE: loop exit
PB: predicated region body
PF: predicated region fallthrough
CT: control target
= control target key end

     0   :  { %s818_s15 = smov 0   ;;  %s820_s16 = smov 0   ;;  %s911_s0 = inlined_call_operand.vmem [shape: f32[2,4,256], index: 0, kind: input, shape index: {}]   ;;  %s912_s1 = inlined_call_operand.vmem [shape: s8[2,1,256], index: 1, kind: input, shape index: {}]   ;;  %s913_s2 = inlined_call_operand.vmem [shape: f32[1,2,1,1], index: 2, kind: output, shape index: {0}]   ;;  %s914_s3 = inlined_call_operand.vmem [shape: f32[1,2,4,1], index: 3, kind: output, shape index: {1}]   ;;  %s915_s4 = inlined_call_operand.vmem [shape: f32[1,2,4,1], index: 4, kind: output, shape index: {2}]  }
   0x1   :  { %s822_s17 = smov 0  }
   0x2 LB: > { %s30_s18 = sadd.s32 1, %s786_s16  ;;  %p720_p0 = scmp.ge.s32.totalorder %s790_s17, 1  ;;  %s790_s17 = sphi %s822_s17, %s15_s17   ;;  %s786_s16 = sphi %s820_s16, %s917_s16   ;;  %s782_s15 = sphi %s818_s15, %s916_s15  }
   0x3   : > { %p32_p1 = scmp.ge.s32.totalorder %s30_s18, 2  ;;  %p239_p2 = scmp.lt.s32.totalorder %s790_s17, 3 }
   0x5   : > { %s919_s18 = smov (%p32_p1, %s30_s18), 0  ;;  %p240_p3 = pnand %p720_p0, %p239_p2 }
   0x6   : > { %p305_p4 = scmp.lt.s32.totalorder (!%p240_p3), %s782_s15, 1 }
   0x7   : > { %243 = sbr.rel (%p240_p3) target bundleno = 208 (0xd0), region = 28 }
   0xc   : > { %s921_s15 = smov (!%p305_p4, %s782_s15), 1  ;;  %vm395_vm0 = vcmask 1043456   ;;  %v466_v12 = vlaneseq  ;;  %v792_v27 = vmov 0.0   ;;  %vm359_vm3 = vcmask 0  }
   0xd   : > { %s730_s19 = sshll.u32 %s921_s15, 3  ;;  %s723_s23 = sshll.u32 %s921_s15, 1  ;;  %vm361_vm12 = vcmask 3072  }
   0xe   : > { %s312_s22 = scalar_lea.vmem %s911_s0, %s730_s19  ;;  %s327_s26 = scalar_lea.vmem %s912_s1, %s723_s23  ;;  %v467_v18 = vshrl.u32 %v466_v12, 7 }
   0xf   : > { %v378_v0 = vld [vmem:[%s312_s22] sm:$0xff]  ;;  %s873_s29 = scalar_lea.vmem %s913_s2, %s921_s15  ;;  %s724_s30 = sshll.u32 %s921_s15, 2 }
  0x10   : > { %382 = vst [vmem:[#allocation1] ss:$2 sm:$0xff] %v378_v0  ;;  %v389_v1 = vld [vmem:[%s327_s26] sm:$0x3]  ;;  %s354_s7 = scalar_lea.vmem %s915_s4, %s724_s30  ;;  %s346_s10 = scalar_lea.vmem %s914_s3, %s724_s30 }
  0x11   : > { %v390_v4 = vunpack.c.0.s8 %v389_v1  ;;  %360 = vst.msk [vmem:[%s873_s29] sm:$0x1] %vm359_vm3, %v792_v27 }
  0x12   : > { %363 = vst.msk [vmem:[%s354_s7] sm:$0xf] %vm361_vm12, %v792_v27 }
  0x13   : > { %v391_v9 = vperm.slane %v390_v4, 0  ;;  %v392_v13 = vperm.slane %v390_v4, 4  ;;  %362 = vst.msk [vmem:[%s346_s10] sm:$0xf] %vm361_vm12, %v792_v27 }
  0x15   : > { %v468_v19 = vperm.slane %v391_v9, 0  ;;  %v469_v20 = vperm.slane %v392_v13, 0 }
  0x17   : > { %v383_v2 = vld.sshfl [vmem:[#allocation1] sm:$0xff pattern:$0x75316420]  ;;  %v384_v3 = vld.sshfl [vmem:[#allocation1 + $0x8] sm:$0xff pattern:$0x75316420]  ;;  %vm470_vm1 = vcmp.eq.s32.totalorder %v467_v18, %v468_v19  ;;  %vm471_vm2 = vcmp.eq.s32.totalorder %v467_v18, %v469_v20 }
  0x18   : > { %v396_v5 = vsel %vm395_vm0, %v383_v2, -inf  ;;  %v403_v6 = vsel %vm395_vm0, %v384_v3, -inf  ;;  %v852_v28 = vsel %vm470_vm1, 1.0, %v792_v27  ;;  %v855_v31 = vsel %vm471_vm2, 1.0, %v792_v27 }
  0x19   : > { %v397_v7 = vrot.slane %v396_v5, 4  ;;  %v404_v8 = vrot.slane %v403_v6, 4  ;;  %v476_v32 = vmul.f32 %v852_v28, %v383_v2  ;;  %v477_v33 = vmul.f32 %v855_v31, %v384_v3 }
  0x1b   : > { %v398_v10 = vmax.f32 %v396_v5, %v397_v7  ;;  %v405_v11 = vmax.f32 %v403_v6, %v404_v8  ;;  %v478_v34 = vsel %vm395_vm0, %v476_v32, 0.0  ;;  %v485_v35 = vsel %vm395_vm0, %v477_v33, 0.0 }
  0x1c   : > { %v479_v39 = vrot.slane %v478_v34, 4  ;;  %v486_v42 = vrot.slane %v485_v35, 4 }
  0x1d   : > { %v399_v14 = vrot.slane %v398_v10, 2  ;;  %v406_v15 = vrot.slane %v405_v11, 2 }
  0x1e   : > { %v480_v46 = vadd.f32 %v479_v39, %v478_v34  ;;  %v487_v48 = vadd.f32 %v486_v42, %v485_v35 }
  0x1f   : > { %v400_v16 = vmax.f32 %v398_v10, %v399_v14  ;;  %v407_v17 = vmax.f32 %v405_v11, %v406_v15 }
  0x20   : > { %v481_v52 = vrot.slane %v480_v46, 2  ;;  %v488_v54 = vrot.slane %v487_v48, 2 }
  0x21   : > { %v401_v21 = vrot.slane %v400_v16, 1  ;;  %v408_v22 = vrot.slane %v407_v17, 1 }
  0x22   : > { %v482_v58 = vadd.f32 %v481_v52, %v480_v46  ;;  %v489_v59 = vadd.f32 %v488_v54, %v487_v48  ;;  %v515_v46 = vld [vmem:[%s354_s7] sm:$0xf] }
  0x23   : > { %v402_v23 = vmax.f32 %v400_v16, %v401_v21  ;;  %v848_v24 = vmax.f32 %v407_v17, %v408_v22 }
  0x24   : > { %v483_v60 = vrot.slane %v482_v58, 1  ;;  %v490_v61 = vrot.slane %v489_v59, 1 }
  0x25   : > { %v410_v25 = vsub.f32 %v383_v2, %v402_v23  ;;  %v411_v26 = vsub.f32 %v384_v3, %v848_v24 }
  0x26   : > { %v484_v1 = vadd.f32 %v483_v60, %v482_v58  ;;  %v491_v3 = vadd.f32 %v490_v61, %v489_v59 }
  0x27   : > { %v412_v29 = vmul.f32 1.442695, %v410_v25  ;;  %v414_v30 = vmul.f32 1.442695, %v411_v26 }
  0x29   : > { %756 = vpow2.f32 %v412_v29 }
  0x2a   : > { %758 = vpow2.f32 %v414_v30 }
  0x2f   : > { %v861_v36 = vpop.eup %756 }
  0x30   : > { %v863_v37 = vpop.eup %758  ;;  %v416_v38 = vsel %vm395_vm0, %v861_v36, 0.0 }
  0x31   : > { %v417_v40 = vrot.slane %v416_v38, 4  ;;  %v423_v41 = vsel %vm395_vm0, %v863_v37, 0.0 }
  0x32   : > { %v424_v43 = vrot.slane %v423_v41, 4 }
  0x33   : > { %v418_v44 = vadd.f32 %v417_v40, %v416_v38 }
  0x34   : > { %v425_v45 = vadd.f32 %v424_v43, %v423_v41 }
  0x35   : > { %v419_v47 = vrot.slane %v418_v44, 2 }
  0x36   : > { %v426_v49 = vrot.slane %v425_v45, 2 }
  0x37   : > { %v420_v50 = vadd.f32 %v419_v47, %v418_v44  ;;  %v504_v47 = vld [vmem:[%s346_s10] sm:$0xf] }
  0x38   : > { %v427_v51 = vadd.f32 %v426_v49, %v425_v45 }
  0x39   : > { %v421_v53 = vrot.slane %v420_v50, 1 }
  0x3a   : > { %v428_v55 = vrot.slane %v427_v51, 1 }
  0x3b   : > { %v422_v56 = vadd.f32 %v421_v53, %v420_v50 }
  0x3c   : > { %v429_v57 = vadd.f32 %v428_v55, %v427_v51 }
  0x3d   : > { %760 = vlog2.f32 %v422_v56  ;;  %vm435_vm6 = vweird.f32 %v422_v56  ;;  %v441_v14 = vand.u32 2147483648, %v422_v56  ;;  %v439_v16 = vand.u32 2147483647, %v422_v56 }
  0x3e   : > { %762 = vrcp.f32 %v429_v57  ;;  %vm449_vm4 = vweird.f32 %v429_v57  ;;  %v455_v8 = vand.u32 2147483648, %v429_v57  ;;  %v453_v11 = vand.u32 2147483647, %v429_v57 }
  0x3f   : > { %764 = vlog2.f32 %v429_v57  ;;  %vm440_vm11 = vcmp.eq.f32.partialorder %v439_v16, 8.507059e+37 }
  0x40   : > { %766 = vrcp.f32 %v422_v56  ;;  %v456_v19 = vor.u32 1.1754944e-38, %v455_v8  ;;  %vm454_vm9 = vcmp.eq.f32.partialorder %v453_v11, 8.507059e+37 }
  0x43   : > { %v761_v62 = vpop.eup %760 }
  0x44   : > { %v763_v63 = vpop.eup %762  ;;  %v461_v0 = vmul.f32 0.6931472, %v761_v62 }
  0x45   : > { %v765_v2 = vpop.eup %764  ;;  %v445_v4 = vmul.f32 %v763_v63, %v429_v57  ;;  %vm450_vm5 = vweird.f32 %v763_v63 }
  0x46   : > { %v767_v5 = vpop.eup %766  ;;  %v463_v6 = vmul.f32 0.6931472, %v765_v2  ;;  %v464_v7 = vadd.f32 %v461_v0, %v402_v23  ;;  %vm451_vm8 = vmor %vm449_vm4, %vm450_vm5  ;;  %v442_v23 = vor.u32 1.1754944e-38, %v441_v14 }
  0x47   : > { %v431_v9 = vmul.f32 %v767_v5, %v422_v56  ;;  %v446_v10 = vsub.f32 1.0, %v445_v4  ;;  %vm436_vm7 = vweird.f32 %v767_v5 }
  0x48   : > { %v465_v12 = vadd.f32 %v463_v6, %v848_v24  ;;  %v492_v13 = vsub.f32 %v464_v7, %v484_v1  ;;  %vm437_vm10 = vmor %vm435_vm6, %vm436_vm7 }
  0x49   : > { %v432_v15 = vsub.f32 1.0, %v431_v9  ;;  %v447_v17 = vmul.f32 %v763_v63, %v446_v10 }
  0x4a   : > { %v493_v18 = vsub.f32 %v465_v12, %v491_v3 }
  0x4b   : > { %v433_v20 = vmul.f32 %v767_v5, %v432_v15  ;;  %v448_v21 = vadd.f32 %v763_v63, %v447_v17 }
  0x4c   : > { %v497_v22 = vadd.f32 %v493_v18, %v492_v13 }
  0x4d   : > { %v434_v25 = vadd.f32 %v767_v5, %v433_v20  ;;  %v452_v24 = vsel %vm451_vm8, %v763_v63, %v448_v21 }
  0x4e   : > { %498 = vadd.xlane.f32.xlu0 %v497_v22  ;;  %v457_v26 = vsel %vm454_vm9, %v456_v19, %v452_v24 }
  0x4f   : > { %v438_v29 = vsel %vm437_vm10, %v767_v5, %v434_v25  ;;  %v459_v30 = vmul.f32 %v863_v37, %v457_v26 }
  0x50   : > { %v443_v32 = vsel %vm440_vm11, %v442_v23, %v438_v29 }
  0x51   : > { %v458_v33 = vmul.f32 %v861_v36, %v443_v32  ;;  %v517_v34 = vadd.f32 %v855_v31, %v459_v30  ;;  %v506_v35 = vmul.f32 %v855_v31, %v459_v30 }
  0x53   : > { %v516_v38 = vadd.f32 %v852_v28, %v458_v33  ;;  %v521_v39 = vsel %vm395_vm0, %v517_v34, 0.0  ;;  %v505_v40 = vmul.f32 %v852_v28, %v458_v33  ;;  %v508_v41 = vsel %vm395_vm0, %v506_v35, 0.0  ;;  %v496_v28 = vld [vmem:[%s873_s29] sm:$0x1] }
  0x55   : > { %v520_v42 = vsel %vm395_vm0, %v516_v38, 0.0  ;;  %v507_v37 = vsel %vm395_vm0, %v505_v40, 0.0 }
  0x56   : > { %v522_v43 = vadd.f32 %v521_v39, %v520_v42  ;;  %v509_v36 = vadd.f32 %v508_v41, %v507_v37 }
  0x58   : > { %523 = vadd.xlane.f32.xlu1 %v522_v43  ;;  %510 = vadd.xlane.f32.xlu0 %v509_v36 }
  0xc1   : > { %v499_v31 = vpop.xlane.xlu0 %498 }
  0xc2   : > { %v500_v44 = vmul.f32 0.00390625, %v499_v31 }
  0xc4   : > { %v501_v45 = vadd.f32 %v500_v44, %v496_v28 }
  0xc6   : > { %503 = vst.msk [vmem:[%s873_s29] sm:$0x1] %vm359_vm3, %v501_v45 }
  0xcb   : > { %v524_v48 = vpop.xlane.xlu1 %523  ;;  %v511_v49 = vpop.xlane.xlu0 %510 }
  0xcc   : > { %v525_v50 = vadd.f32 %v524_v48, %v515_v46  ;;  %v512_v51 = vadd.f32 %v511_v49, %v504_v47 }
  0xce   : > { %526 = vst.msk [vmem:[%s354_s7] sm:$0xf] %vm361_vm12, %v525_v50 }
  0xcf   : > { %514 = vst.msk [vmem:[%s346_s10] sm:$0xf] %vm361_vm12, %v512_v51 }
  0xd0 PF: > { %s15_s17 = sadd.s32 1, %s790_s17   ;;  %s916_s15 = smov %s786_s16 }
  0xd1   : > { %p12_p5 = scmp.ge.s32.totalorder %s15_s17, 4   ;;  %s917_s16 = smov %s919_s18 }
  0xd3   :  { %14 = sbr.rel (!%p12_p5) target bundleno = 2 (0x2), region = 89 }

</bundles_post_ra>
